<compile_context>
chip_gen: v5e
topology: v5e:2x2
jax: 0.10.0
libtpu: 0.0.40
codegen_flags: <defaults>
</compile_context>

<pallas_src>
import math
from functools import partial

import jax
import jax.numpy as jnp
from jax.experimental import pallas as pl
from jax.experimental.pallas import tpu as pltpu


# -----------------------------------------------------------------------------
# Pallas kernel: LayerNorm -> Linear -> exact GELU -> one fused wide projection
# -----------------------------------------------------------------------------
def _dense_selective_kernel(
    x_ref,        # (TM, D_in)        token tile
    gamma_ref,    # (1, D_in)         layernorm weight
    beta_ref,     # (1, D_in)         layernorm bias
    w_in_ref,     # (D_in, H)         input projection weight (transposed)
    b_in_ref,     # (1, H)
    w_cat_ref,    # (H, OUT_TOTAL)    concat of A/B/C/D projection weights
    b_cat_ref,    # (1, OUT_TOTAL)    concat of A/B/C/D projection biases
    out_ref,      # (TM, OUT_TOTAL)
):
    x = x_ref[...]

    # --- LayerNorm over the feature axis, eps = 1e-5 (PyTorch default)
    mean = jnp.mean(x, axis=-1, keepdims=True)
    centered = x - mean
    var = jnp.mean(centered * centered, axis=-1, keepdims=True)
    xn = centered * jax.lax.rsqrt(var + 1e-5)
    xn = xn * gamma_ref[...] + beta_ref[...]

    # --- Input projection + exact (erf-based) GELU, matching nn.GELU()
    h = jnp.dot(xn, w_in_ref[...], preferred_element_type=jnp.float32)
    h = h + b_in_ref[...]
    inv_sqrt2 = jnp.float32(1.0 / math.sqrt(2.0))
    h = 0.5 * h * (1.0 + jax.lax.erf(h * inv_sqrt2))

    # --- Single fused, lane-dense parameter projection (A|B|C|D concatenated)
    out_ref[...] = (
        jnp.dot(h, w_cat_ref[...], preferred_element_type=jnp.float32)
        + b_cat_ref[...]
    )


# -----------------------------------------------------------------------------
# Parameter construction (deterministic, mirrors the PyTorch __init__ shapes)
# -----------------------------------------------------------------------------
def _xavier_uniform(key, fan_in, fan_out, gain):
    bound = gain * math.sqrt(6.0 / (fan_in + fan_out))
    # stored as (fan_in, fan_out), i.e. already transposed relative to torch
    return jax.random.uniform(
        key, (fan_in, fan_out), jnp.float32, minval=-bound, maxval=bound
    )


def init_params(key, input_dim, state_dim, hidden_dim, init_scale=0.01):
    p = hidden_dim  # param_proj_dim defaults to hidden_dim
    keys = jax.random.split(key, 6)

    # LayerNorm (elementwise affine, default init)
    gamma = jnp.ones((1, input_dim), jnp.float32)
    beta = jnp.zeros((1, input_dim), jnp.float32)

    # InputProjection linear: PyTorch default uniform(-1/sqrt(fan_in), +)
    k = 1.0 / math.sqrt(input_dim)
    w_in = jax.random.uniform(keys[0], (input_dim, hidden_dim), jnp.float32,
                              minval=-k, maxval=k)
    b_in = jax.random.uniform(keys[1], (1, hidden_dim), jnp.float32,
                              minval=-k, maxval=k)

    # Parameter projections: xavier_uniform with gain=init_scale, zero bias
    wA = _xavier_uniform(keys[2], p, state_dim * state_dim, init_scale)
    wB = _xavier_uniform(keys[3], p, state_dim * hidden_dim, init_scale)
    wC = _xavier_uniform(keys[4], p, hidden_dim * state_dim, init_scale)
    wD = _xavier_uniform(keys[5], p, hidden_dim * hidden_dim, init_scale)
    bA = jnp.zeros((1, state_dim * state_dim), jnp.float32)
    bB = jnp.zeros((1, state_dim * hidden_dim), jnp.float32)
    bC = jnp.zeros((1, hidden_dim * state_dim), jnp.float32)
    bD = jnp.zeros((1, hidden_dim * hidden_dim), jnp.float32)

    return dict(gamma=gamma, beta=beta, w_in=w_in, b_in=b_in,
                wA=wA, bA=bA, wB=wB, bB=bB, wC=wC, bC=bC, wD=wD, bD=bD)


# -----------------------------------------------------------------------------
# Wrapper
# -----------------------------------------------------------------------------
def _round_up(x, m):
    return ((x + m - 1) // m) * m


@partial(jax.jit, static_argnames=("state_dim", "hidden_dim"))
def dense_selective_parameterization(x, params, *, state_dim, hidden_dim):
    batch, seq, input_dim = x.shape
    M = batch * seq
    H = hidden_dim
    N = state_dim

    d_a = N * N
    d_b = N * H
    d_c = H * N
    d_d = H * H
    out_total = d_a + d_b + d_c + d_d

    # Fuse the four projections into one wide, lane-dense projection.
    w_cat = jnp.concatenate(
        [params["wA"], params["wB"], params["wC"], params["wD"]], axis=1)
    b_cat = jnp.concatenate(
        [params["bA"], params["bB"], params["bC"], params["bD"]], axis=1)

    # ---- Tile sizing: double-buffered input+output tiles + resident weights
    # must fit comfortably inside the smallest generation budget (v7x: 64 MiB
    # physical). Target ~24 MiB for the pipelined tiles.
    weight_bytes = 4 * (2 * input_dim            # gamma/beta
                        + input_dim * H + H      # w_in / b_in
                        + H * out_total + out_total)  # w_cat / b_cat
    tile_budget = 24 * 1024 * 1024 - 2 * weight_bytes
    bytes_per_row = 4 * (input_dim + out_total + H)   # in tile + out tile + h
    tm_max = max(8, (tile_budget // (2 * bytes_per_row)) // 8 * 8)
    TM = int(min(512, tm_max, _round_up(M, 8)))
    TM = max(8, (TM // 8) * 8)

    M_pad = _round_up(M, TM)
    x_flat = x.reshape(M, input_dim)
    if M_pad != M:
        # Zero rows: LayerNorm/rsqrt on them is finite; rows are discarded below.
        x_flat = jnp.pad(x_flat, ((0, M_pad - M), (0, 0)))

    grid = (pl.cdiv(M_pad, TM),)

    def resident(shape):
        # Weights/biases: same block for every grid step -> DMAed once, stay
        # resident in VMEM.
        return pl.BlockSpec(shape, lambda i: (0, 0))

    in_specs = [
        pl.BlockSpec((TM, input_dim), lambda i: (i, 0)),   # x tile, pipelined
        resident((1, input_dim)),                          # gamma
        resident((1, input_dim)),                          # beta
        resident((input_dim, H)),                          # w_in
        resident((1, H)),                                  # b_in
        resident((H, out_total)),                          # w_cat
        resident((1, out_total)),                          # b_cat
    ]
    out_specs = pl.BlockSpec((TM, out_total), lambda i: (i, 0))

    # Explicit VMEM limit: at least the default-ish 32 MiB, never above v7x's
    # 64 MiB physical capacity.
    needed = 2 * weight_bytes + 2 * TM * bytes_per_row
    vmem_limit = int(min(max(2 * needed, 32 * 1024 * 1024), 56 * 1024 * 1024))

    cost = pl.CostEstimate(
        flops=2 * M_pad * (input_dim * H + H * out_total),
        transcendentals=M_pad * H,  # erf in the GELU
        bytes_accessed=4 * (M_pad * (input_dim + out_total)
                            + input_dim * H + H * out_total),
    )

    out_flat = pl.pallas_call(
        _dense_selective_kernel,
        out_shape=jax.ShapeDtypeStruct((M_pad, out_total), jnp.float32),
        grid=grid,
        in_specs=in_specs,
        out_specs=out_specs,
        compiler_params=pltpu.CompilerParams(
            dimension_semantics=("parallel",),
            vmem_limit_bytes=vmem_limit,
        ),
        cost_estimate=cost,
    )(x_flat, params["gamma"], params["beta"], params["w_in"], params["b_in"],
      w_cat, b_cat)

    out_flat = out_flat[:M]
    A = out_flat[:, :d_a].reshape(batch, seq, N, N)
    B = out_flat[:, d_a:d_a + d_b].reshape(batch, seq, N, H)
    C = out_flat[:, d_a + d_b:d_a + d_b + d_c].reshape(batch, seq, H, N)
    D = out_flat[:, d_a + d_b + d_c:].reshape(batch, seq, H, H)
    return {"A": A, "B": B, "C": C, "D": D}


if __name__ == "__main__":
    # Small shapes consistent with the module's forward
    batch, seq = 2, 8
    input_dim, hidden_dim, state_dim = 16, 32, 4

    key = jax.random.PRNGKey(0)
    k_x, k_p = jax.random.split(key)

    x = jax.random.normal(k_x, (batch, seq, input_dim), jnp.float32)
    params = init_params(k_p, input_dim, state_dim, hidden_dim, init_scale=0.01)

    out = dense_selective_parameterization(
        x, params, state_dim=state_dim, hidden_dim=hidden_dim
    )
    jax.block_until_ready(out)

    assert out["A"].shape == (batch, seq, state_dim, state_dim)
    assert out["B"].shape == (batch, seq, state_dim, hidden_dim)
    assert out["C"].shape == (batch, seq, hidden_dim, state_dim)
    assert out["D"].shape == (batch, seq, hidden_dim, hidden_dim)

    # Lightweight sanity check against a pure-JAX reference of the same math.
    def ref(x, p):
        mean = x.mean(-1, keepdims=True)
        var = ((x - mean) ** 2).mean(-1, keepdims=True)
        xn = (x - mean) / jnp.sqrt(var + 1e-5) * p["gamma"][0] + p["beta"][0]
        h = xn @ p["w_in"] + p["b_in"][0]
        h = 0.5 * h * (1.0 + jax.lax.erf(h / jnp.sqrt(2.0)))
        return {
            "A": (h @ p["wA"] + p["bA"][0]).reshape(batch, seq, state_dim, state_dim),
            "B": (h @ p["wB"] + p["bB"][0]).reshape(batch, seq, state_dim, hidden_dim),
            "C": (h @ p["wC"] + p["bC"][0]).reshape(batch, seq, hidden_dim, state_dim),
            "D": (h @ p["wD"] + p["bD"][0]).reshape(batch, seq, hidden_dim, hidden_dim),
        }

    r = ref(x, params)
    for k in ("A", "B", "C", "D"):
        assert jnp.allclose(out[k], r[k], atol=1e-5, rtol=1e-5), k

    print("KERNEL_OK")
</pallas_src>

<mosaic_0001>
module attributes {stable_mosaic.version = 11 : i64} {
  func.func @_dense_selective_kernel(%arg0: i32, %arg1: memref<16x16xf32, #tpu.memory_space<vmem>>, %arg2: memref<1x16xf32, #tpu.memory_space<vmem>>, %arg3: memref<1x16xf32, #tpu.memory_space<vmem>>, %arg4: memref<16x32xf32, #tpu.memory_space<vmem>>, %arg5: memref<1x32xf32, #tpu.memory_space<vmem>>, %arg6: memref<32x1296xf32, #tpu.memory_space<vmem>>, %arg7: memref<1x1296xf32, #tpu.memory_space<vmem>>, %arg8: memref<16x1296xf32, #tpu.memory_space<vmem>>) attributes {dimension_semantics = [#tpu.dimension_semantics<parallel>], iteration_bounds = array<i64: 1>, scalar_prefetch = 0 : i64, scratch_operands = 0 : i64, tpu.core_type = #tpu.core_type<tc>, window_params = [{transform_indices = @transform_0, window_bounds = array<i64: 16, 16>}, {pipeline_mode = #tpu.pipeline_mode<synchronous>, transform_indices = @transform_1, window_bounds = array<i64: 1, 16>}, {pipeline_mode = #tpu.pipeline_mode<synchronous>, transform_indices = @transform_2, window_bounds = array<i64: 1, 16>}, {pipeline_mode = #tpu.pipeline_mode<synchronous>, transform_indices = @transform_3, window_bounds = array<i64: 16, 32>}, {pipeline_mode = #tpu.pipeline_mode<synchronous>, transform_indices = @transform_4, window_bounds = array<i64: 1, 32>}, {pipeline_mode = #tpu.pipeline_mode<synchronous>, transform_indices = @transform_5, window_bounds = array<i64: 32, 1296>}, {pipeline_mode = #tpu.pipeline_mode<synchronous>, transform_indices = @transform_6, window_bounds = array<i64: 1, 1296>}, {transform_indices = @transform_7, window_bounds = array<i64: 16, 1296>}]} {
    %c0 = arith.constant 0 : index
    %c0_0 = arith.constant 0 : index
    %0 = vector.load %arg1[%c0, %c0_0] : memref<16x16xf32, #tpu.memory_space<vmem>>, vector<16x16xf32>
    %cst = arith.constant dense<0.000000e+00> : vector<16xf32>
    %1 = vector.multi_reduction <add>, %0, %cst [1] : vector<16x16xf32> to vector<16xf32>
    %2 = vector.shape_cast %1 : vector<16xf32> to vector<16x1xf32>
    %cst_1 = arith.constant 1.600000e+01 : f32
    %3 = vector.broadcast %cst_1 : f32 to vector<16x1xf32>
    %4 = arith.divf %2, %3 : vector<16x1xf32>
    %5 = vector.broadcast %4 : vector<16x1xf32> to vector<16x16xf32>
    %6 = arith.subf %0, %5 : vector<16x16xf32>
    %7 = arith.mulf %6, %6 : vector<16x16xf32>
    %cst_2 = arith.constant dense<0.000000e+00> : vector<16xf32>
    %8 = vector.multi_reduction <add>, %7, %cst_2 [1] : vector<16x16xf32> to vector<16xf32>
    %9 = vector.shape_cast %8 : vector<16xf32> to vector<16x1xf32>
    %cst_3 = arith.constant 1.600000e+01 : f32
    %10 = vector.broadcast %cst_3 : f32 to vector<16x1xf32>
    %11 = arith.divf %9, %10 : vector<16x1xf32>
    %cst_4 = arith.constant 9.99999974E-6 : f32
    %12 = vector.broadcast %cst_4 : f32 to vector<16x1xf32>
    %13 = arith.addf %11, %12 : vector<16x1xf32>
    %14 = math.rsqrt %13 : vector<16x1xf32>
    %15 = vector.broadcast %14 : vector<16x1xf32> to vector<16x16xf32>
    %16 = arith.mulf %6, %15 : vector<16x16xf32>
    %c0_5 = arith.constant 0 : index
    %c0_6 = arith.constant 0 : index
    %17 = vector.load %arg2[%c0_5, %c0_6] : memref<1x16xf32, #tpu.memory_space<vmem>>, vector<1x16xf32>
    %18 = vector.broadcast %17 : vector<1x16xf32> to vector<16x16xf32>
    %19 = arith.mulf %16, %18 : vector<16x16xf32>
    %c0_7 = arith.constant 0 : index
    %c0_8 = arith.constant 0 : index
    %20 = vector.load %arg3[%c0_7, %c0_8] : memref<1x16xf32, #tpu.memory_space<vmem>>, vector<1x16xf32>
    %21 = vector.broadcast %20 : vector<1x16xf32> to vector<16x16xf32>
    %22 = arith.addf %19, %21 : vector<16x16xf32>
    %c0_9 = arith.constant 0 : index
    %c0_10 = arith.constant 0 : index
    %23 = vector.load %arg4[%c0_9, %c0_10] : memref<16x32xf32, #tpu.memory_space<vmem>>, vector<16x32xf32>
    %cst_11 = arith.constant dense<0.000000e+00> : vector<16x32xf32>
    %24 = tpu.matmul %22, %23, %cst_11 {dimension_numbers = #tpu.dot_dimension_numbers<[1], [0], [0], [1], [0, 0, 1, 1], [], []>} : vector<16x16xf32>, vector<16x32xf32>, vector<16x32xf32> -> vector<16x32xf32>
    %c0_12 = arith.constant 0 : index
    %c0_13 = arith.constant 0 : index
    %25 = vector.load %arg5[%c0_12, %c0_13] : memref<1x32xf32, #tpu.memory_space<vmem>>, vector<1x32xf32>
    %26 = vector.broadcast %25 : vector<1x32xf32> to vector<16x32xf32>
    %27 = arith.addf %24, %26 : vector<16x32xf32>
    %cst_14 = arith.constant 5.000000e-01 : f32
    %28 = vector.broadcast %cst_14 : f32 to vector<16x32xf32>
    %29 = arith.mulf %28, %27 : vector<16x32xf32>
    %cst_15 = arith.constant 0.707106769 : f32
    %30 = vector.broadcast %cst_15 : f32 to vector<16x32xf32>
    %31 = arith.mulf %27, %30 : vector<16x32xf32>
    %32 = math.erf %31 : vector<16x32xf32>
    %cst_16 = arith.constant 1.000000e+00 : f32
    %33 = vector.broadcast %cst_16 : f32 to vector<16x32xf32>
    %34 = arith.addf %33, %32 : vector<16x32xf32>
    %35 = arith.mulf %29, %34 : vector<16x32xf32>
    %c0_17 = arith.constant 0 : index
    %c0_18 = arith.constant 0 : index
    %36 = vector.load %arg6[%c0_17, %c0_18] : memref<32x1296xf32, #tpu.memory_space<vmem>>, vector<32x1296xf32>
    %cst_19 = arith.constant dense<0.000000e+00> : vector<16x1296xf32>
    %37 = tpu.matmul %35, %36, %cst_19 {dimension_numbers = #tpu.dot_dimension_numbers<[1], [0], [0], [1], [0, 0, 1, 1], [], []>} : vector<16x32xf32>, vector<32x1296xf32>, vector<16x1296xf32> -> vector<16x1296xf32>
    %c0_20 = arith.constant 0 : index
    %c0_21 = arith.constant 0 : index
    %38 = vector.load %arg7[%c0_20, %c0_21] : memref<1x1296xf32, #tpu.memory_space<vmem>>, vector<1x1296xf32>
    %39 = vector.broadcast %38 : vector<1x1296xf32> to vector<16x1296xf32>
    %40 = arith.addf %37, %39 : vector<16x1296xf32>
    %c0_22 = arith.constant 0 : index
    %c0_23 = arith.constant 0 : index
    %41 = vector.load %arg8[%c0_22, %c0_23] : memref<16x1296xf32, #tpu.memory_space<vmem>>, vector<16x1296xf32>
    tpu.vector_store %arg8[%c0_22, %c0_23], %40 {strides = array<i32>} : memref<16x1296xf32, #tpu.memory_space<vmem>>, vector<16x1296xf32>,
    return
  }
  func.func @transform_0(%arg0: i32) -> (i32, i32) {
    %c0_i32 = arith.constant 0 : i32
    %c0_i32_0 = arith.constant 0 : i32
    return %arg0, %c0_i32 : i32, i32
  }
  func.func @transform_1(%arg0: i32) -> (i32, i32) {
    %c0_i32 = arith.constant 0 : i32
    %c0_i32_0 = arith.constant 0 : i32
    %c0_i32_1 = arith.constant 0 : i32
    return %c0_i32, %c0_i32_0 : i32, i32
  }
  func.func @transform_2(%arg0: i32) -> (i32, i32) {
    %c0_i32 = arith.constant 0 : i32
    %c0_i32_0 = arith.constant 0 : i32
    %c0_i32_1 = arith.constant 0 : i32
    return %c0_i32, %c0_i32_0 : i32, i32
  }
  func.func @transform_3(%arg0: i32) -> (i32, i32) {
    %c0_i32 = arith.constant 0 : i32
    %c0_i32_0 = arith.constant 0 : i32
    %c0_i32_1 = arith.constant 0 : i32
    return %c0_i32, %c0_i32_0 : i32, i32
  }
  func.func @transform_4(%arg0: i32) -> (i32, i32) {
    %c0_i32 = arith.constant 0 : i32
    %c0_i32_0 = arith.constant 0 : i32
    %c0_i32_1 = arith.constant 0 : i32
    return %c0_i32, %c0_i32_0 : i32, i32
  }
  func.func @transform_5(%arg0: i32) -> (i32, i32) {
    %c0_i32 = arith.constant 0 : i32
    %c0_i32_0 = arith.constant 0 : i32
    %c0_i32_1 = arith.constant 0 : i32
    return %c0_i32, %c0_i32_0 : i32, i32
  }
  func.func @transform_6(%arg0: i32) -> (i32, i32) {
    %c0_i32 = arith.constant 0 : i32
    %c0_i32_0 = arith.constant 0 : i32
    %c0_i32_1 = arith.constant 0 : i32
    return %c0_i32, %c0_i32_0 : i32, i32
  }
  func.func @transform_7(%arg0: i32) -> (i32, i32) {
    %c0_i32 = arith.constant 0 : i32
    %c0_i32_0 = arith.constant 0 : i32
    return %arg0, %c0_i32 : i32, i32
  }
}

</mosaic_0001>

<bundles_post_ra>
// kernel: dense_selective_parameterization.1
= control target key start
LH: loop header
LB: loop body
LE: loop exit
PB: predicated region body
PF: predicated region fallthrough
CT: control target
= control target key end

     0   :  { %vm28_vm0 = vcmask 130048   ;;  %v611_v4 = vmov 16.0   ;;  %vm285_vm14 = vcmask 261120   ;;  %s956_s0 = inlined_call_operand.vmem [shape: f32[16,16], index: 0, kind: input, shape index: {}]   ;;  %s957_s1 = inlined_call_operand.vmem [shape: f32[1,16], index: 1, kind: input, shape index: {}]   ;;  %s958_s2 = inlined_call_operand.vmem [shape: f32[1,16], index: 2, kind: input, shape index: {}]   ;;  %s959_s4 = inlined_call_operand.vmem [shape: f32[1,32], index: 4, kind: input, shape index: {}]   ;;  %s960_s3 = inlined_call_operand.vmem [shape: f32[16,32], index: 3, kind: input, shape index: {}]   ;;  %s961_s5 = inlined_call_operand.vmem [shape: f32[32,1296], index: 5, kind: input, shape index: {}]   ;;  %s962_s6 = inlined_call_operand.vmem [shape: f32[1,1296], index: 6, kind: input, shape index: {}]   ;;  %s963_s7 = inlined_call_operand.vmem [shape: f32[16,1296], index: 7, kind: output, shape index: {}]  }
   0x1   :  { %v26_v0 = vld [vmem:[%s956_s0] sm:$0xff]  ;;  %v27_v2 = vld [vmem:[%s956_s0 + $0x8] sm:$0xff]  ;;  %601 = vrcp.f32 %v611_v4 }
   0x2   :  { %v29_v1 = vsel %vm28_vm0, %v26_v0, 0.0  ;;  %v32_v3 = vsel %vm28_vm0, %v27_v2, 0.0  ;;  %v93_v21 = vld [vmem:[%s960_s3 + $0x8] sm:$0xff]  ;;  %v92_v22 = vld [vmem:[%s960_s3] sm:$0xff] }
   0x3   :  { %30 = vadd.xlane.f32.xlu0 %v29_v1  ;;  %118 = vmatpush.msra.mxu0 %v93_v21  ;;  %v598_v37 = vld [vmem:[%s957_s1] ss:$0 sm:$0xff]  ;;  %v226_v21 = vld [vmem:[%s961_s5 + $0x58] sm:$0xff] }
   0x4   :  { %v599_v41 = vld [vmem:[%s958_s2] ss:$0 sm:$0xff] }
   0x5   :  { %119 = vmatpush.msra.mxu0 %v92_v22  ;;  %v600_v51 = vld [vmem:[%s959_s4] ss:$0 sm:$0xff] }
   0x6   :  { %v227_v22 = vld [vmem:[%s961_s5 + $0x60] sm:$0xff] }
   0x7   :  { %v602_v5 = vpop.eup %601 }
   0x8   :  { %v36_v6 = vmul.f32 16.0, %v602_v5  ;;  %vm40_vm1 = vweird.f32 %v602_v5 }
   0xa   :  { %v37_v7 = vsub.f32 1.0, %v36_v6  ;;  %v248_v6 = vld [vmem:[%s961_s5 + $0x108] sm:$0xff] }
   0xb   :  { %33 = vadd.xlane.f32.xlu0 %v32_v3  ;;  %304 = vmatpush.msra.mxu1 %v248_v6  ;;  %v233_v6 = vld [vmem:[%s961_s5 + $0x90] sm:$0xff] }
   0xc   :  { %v38_v8 = vmul.f32 %v602_v5, %v37_v7  ;;  %v249_v7 = vld [vmem:[%s961_s5 + $0x110] sm:$0xff] }
   0xd   :  { %327 = vmatpush.msra.mxu2 %v249_v7  ;;  %v219_v7 = vld [vmem:[%s961_s5 + $0x20] sm:$0xff] }
   0xe   :  { %v39_v9 = vadd.f32 %v602_v5, %v38_v8  ;;  %v250_v8 = vld [vmem:[%s961_s5 + $0x118] sm:$0xff] }
   0xf   :  { %350 = vmatpush.msra.mxu3 %v250_v8 }
  0x10   :  { %v41_v10 = vsel %vm40_vm1, %v602_v5, %v39_v9 }
  0x76   :  { %v31_v11 = vpop.xlane.xlu0 %30 }
  0x77   :  { %v42_v12 = vmul.f32 %v41_v10, %v31_v11 }
  0x79   :  { %v44_v13 = vsub.f32 %v26_v0, %v42_v12 }
  0x7b   :  { %v46_v14 = vmul.f32 %v44_v13, %v44_v13 }
  0x7d   :  { %v48_v15 = vsel %vm28_vm0, %v46_v14, 0.0  ;;  %v238_v14 = vld [vmem:[%s961_s5 + $0xb8] sm:$0xff] }
  0x7e   :  { %49 = vadd.xlane.f32.xlu1 %v48_v15  ;;  %v34_v16 = vpop.xlane.xlu0 %33  ;;  %328 = vmatpush.msra.mxu2 %v238_v14 }
  0x7f   :  { %v43_v17 = vmul.f32 %v41_v10, %v34_v16  ;;  %v239_v16 = vld [vmem:[%s961_s5 + $0xc0] sm:$0xff] }
  0x80   :  { %351 = vmatpush.msra.mxu3 %v239_v16  ;;  %329 = vmatpush.msra.mxu2 %v227_v22 }
  0x81   :  { %v45_v18 = vsub.f32 %v27_v2, %v43_v17  ;;  %v240_v17 = vld [vmem:[%s961_s5 + $0xc8] sm:$0xff] }
  0x83   :  { %v47_v19 = vmul.f32 %v45_v18, %v45_v18 }
  0x85   :  { %v51_v20 = vsel %vm28_vm0, %v47_v19, 0.0 }
  0x86   :  { %52 = vadd.xlane.f32.xlu1 %v51_v20 }
  0xf1   :  { %v50_v23 = vpop.xlane.xlu1 %49 }
  0xf2   :  { %v54_v24 = vmul.f32 %v50_v23, %v41_v10 }
  0xf4   :  { %v56_v25 = vadd.f32 1e-05, %v54_v24  ;;  %v228_v24 = vld [vmem:[%s961_s5 + $0x68] sm:$0xff] }
  0xf5   :  { %352 = vmatpush.msra.mxu3 %v228_v24 }
  0xf6   :  { %603 = vrsqrt.f32 %v56_v25  ;;  %vm64_vm3 = vweird.f32 %v56_v25 }
  0xf9   :  { %v53_v26 = vpop.xlane.xlu1 %52 }
  0xfa   :  { %v55_v27 = vmul.f32 %v53_v26, %v41_v10  ;;  %v251_v10 = vld [vmem:[%s961_s5 + $0x120] sm:$0xff] }
  0xfb   :  { %373 = vmatpush.msrb.mxu0 %v251_v10 }
  0xfc   :  { %v604_v28 = vpop.eup %603  ;;  %v57_v29 = vadd.f32 1e-05, %v55_v27 }
  0xfd   :  { %v59_v30 = vmul.f32 %v604_v28, %v56_v25  ;;  %vm65_vm2 = vweird.f32 %v604_v28  ;;  %374 = vmatpush.msrb.mxu0 %v240_v17  ;;  %v229_v25 = vld [vmem:[%s961_s5 + $0x70] sm:$0xff] }
  0xfe   :  { %605 = vrsqrt.f32 %v57_v29  ;;  %vm66_vm4 = vmor %vm64_vm3, %vm65_vm2  ;;  %vm74_vm6 = vweird.f32 %v57_v29 }
  0xff   :  { %v60_v31 = vmul.f32 %v604_v28, %v59_v30  ;;  %375 = vmatpush.msrb.mxu0 %v229_v25  ;;  %v217_v30 = vld [vmem:[%s961_s5 + $0x10] sm:$0xff] }
 0x100   :  { %353 = vmatpush.msra.mxu3 %v217_v30 }
 0x101   :  { %v61_v32 = vmul.f32 0.5, %v60_v31 }
 0x103   :  { %v62_v33 = vsub.f32 1.5, %v61_v32  ;;  %v218_v32 = vld [vmem:[%s961_s5 + $0x18] sm:$0xff] }
 0x104   :  { %v606_v34 = vpop.eup %605  ;;  %376 = vmatpush.msrb.mxu0 %v218_v32 }
 0x105   :  { %v63_v35 = vmul.f32 %v604_v28, %v62_v33  ;;  %v69_v36 = vmul.f32 %v606_v34, %v57_v29  ;;  %vm75_vm5 = vweird.f32 %v606_v34  ;;  %v216_v29 = vld [vmem:[%s961_s5 + $0x8] sm:$0xff] }
 0x106   :  { %vm76_vm7 = vmor %vm74_vm6, %vm75_vm5  ;;  %330 = vmatpush.msra.mxu2 %v216_v29 }
 0x107   :  { %v67_v38 = vsel %vm66_vm4, %v604_v28, %v63_v35  ;;  %v70_v39 = vmul.f32 %v606_v34, %v69_v36  ;;  %v215_v28 = vld [vmem:[%s961_s5] sm:$0xff] }
 0x108   :  { %v78_v40 = vmul.f32 %v67_v38, %v44_v13  ;;  %v237_v13 = vld [vmem:[%s961_s5 + $0xb0] sm:$0xff] }
 0x109   :  { %v71_v42 = vmul.f32 0.5, %v70_v39  ;;  %305 = vmatpush.msra.mxu1 %v237_v13 }
 0x10a   :  { %v84_v43 = vmul.f32 %v598_v37, %v78_v40 }
 0x10b   :  { %v72_v44 = vsub.f32 1.5, %v71_v42  ;;  %306 = vmatpush.msra.mxu1 %v226_v21  ;;  %v253_v42 = vld [vmem:[%s961_s5 + $0x130] sm:$0xff] }
 0x10c   :  { %v90_v45 = vadd.f32 %v599_v41, %v84_v43  ;;  %v254_v43 = vld [vmem:[%s961_s5 + $0x138] sm:$0xff]  ;;  %419 = vmatpush.msrb.mxu2 %v253_v42  ;;  %v235_v42 = vld [vmem:[%s961_s5 + $0xa0] sm:$0xff] }
 0x10d   :  { %v73_v46 = vmul.f32 %v606_v34, %v72_v44  ;;  %307 = vmatpush.msra.mxu1 %v215_v28  ;;  %v242_v44 = vld [vmem:[%s961_s5 + $0xd8] sm:$0xff]  ;;  %442 = vmatpush.msrb.mxu3 %v254_v43  ;;  %v236_v43 = vld [vmem:[%s961_s5 + $0xa8] sm:$0xff] }
 0x10e   :  { %571 = vmatmul.msk.f32.vlgmr.msra.gmra.mxu0 %vm28_vm0, %v90_v45  ;;  %420 = vmatpush.msrb.mxu2 %v242_v44  ;;  %v234_v44 = vld [vmem:[%s961_s5 + $0x98] sm:$0xff] }
 0x10f   :  { %v77_v47 = vsel %vm76_vm7, %v606_v34, %v73_v46  ;;  %v243_v46 = vld [vmem:[%s961_s5 + $0xe0] sm:$0xff] }
 0x110   :  { %v79_v48 = vmul.f32 %v77_v47, %v45_v18  ;;  %v252_v47 = vld [vmem:[%s961_s5 + $0x128] sm:$0xff]  ;;  %443 = vmatpush.msrb.mxu3 %v243_v46 }
 0x111   :  { %396 = vmatpush.msrb.mxu1 %v252_v47  ;;  %v224_v47 = vld [vmem:[%s961_s5 + $0x48] sm:$0xff] }
 0x112   :  { %v85_v49 = vmul.f32 %v598_v37, %v79_v48 }
 0x114   :  { %v91_v50 = vadd.f32 %v599_v41, %v85_v49 }
 0x116   :  { %572 = vmatmul.msk.f32.gmra.mxu0 %vm28_vm0, %v91_v50  ;;  %v231_v50 = vld [vmem:[%s961_s5 + $0x80] sm:$0xff] }
 0x117   :  { %421 = vmatpush.msrb.mxu2 %v231_v50  ;;  %v259_v50 = vld [vmem:[%s962_s6] sm:$0xff] }
 0x18b   :  { %v121_v52 = vpop.f32.mrf.mxu0 }
 0x18c   :  { %v679_v53 = vadd.f32 %v600_v51, %v121_v52  ;;  %v232_v52 = vld [vmem:[%s961_s5 + $0x88] sm:$0xff] }
 0x18d   :  { %444 = vmatpush.msrb.mxu3 %v232_v52  ;;  %v266_v52 = vperm.slane %v259_v50, 3 }
 0x18e   :  { %v682_v54 = vmul.f32 0.70710677, %v679_v53  ;;  %v127_v30 = vmul.f32 0.5, %v679_v53 }
 0x190   :  { %v131_v55 = vmul.f32 %v682_v54, %v682_v54 }
 0x192   :  { %v686_v56 = vmin.f32 %v131_v55, 16.0  ;;  %v255_v55 = vld [vmem:[%s961_s5 + $0x140] sm:$0xff] }
 0x193   :  { %v124_v57 = vpop.f32.mrf.mxu0  ;;  %465 = vmatpush.msra.mxu0 %v255_v55 }
 0x194   :  { %v133_v58 = vmul.f32 2.1237322e-06, %v686_v56  ;;  %v144_v59 = vmul.f32 3.8918573e-05, %v686_v56  ;;  %v690_v60 = vadd.f32 %v600_v51, %v124_v57  ;;  %v241_v57 = vld [vmem:[%s961_s5 + $0xd0] sm:$0xff] }
 0x195   :  { %397 = vmatpush.msrb.mxu1 %v241_v57 }
 0x196   :  { %v134_v61 = vadd.f32 0.00028619796, %v133_v58  ;;  %v145_v62 = vadd.f32 0.001143296, %v144_v59  ;;  %v693_v63 = vmul.f32 0.70710677, %v690_v60 }
 0x197   :  { %v244_v59 = vld [vmem:[%s961_s5 + $0xe8] sm:$0xff] }
 0x198   :  { %v135_v0 = vmul.f32 %v134_v61, %v686_v56  ;;  %v146_v1 = vmul.f32 %v145_v62, %v686_v56  ;;  %v171_v2 = vmul.f32 %v693_v63, %v693_v63  ;;  %v220_v61 = vld [vmem:[%s961_s5 + $0x28] sm:$0xff]  ;;  %v221_v62 = vld [vmem:[%s961_s5 + $0x30] sm:$0xff]  ;;  %466 = vmatpush.msra.mxu0 %v244_v59 }
 0x199   :  { %422 = vmatpush.msrb.mxu2 %v220_v61  ;;  %445 = vmatpush.msrb.mxu3 %v221_v62  ;;  %v264_v61 = vperm.slane %v259_v50, 1  ;;  %v265_v62 = vperm.slane %v259_v50, 2 }
 0x19a   :  { %v147_v3 = vadd.f32 0.014752088, %v146_v1  ;;  %v136_v4 = vadd.f32 0.0036580483, %v135_v0  ;;  %v699_v5 = vmin.f32 %v171_v2, 16.0  ;;  %v230_v1 = vld [vmem:[%s961_s5 + $0x78] sm:$0xff]  ;;  %467 = vmatpush.msra.mxu0 %v233_v6 }
 0x19b   :  { %398 = vmatpush.msrb.mxu1 %v230_v1 }
 0x19c   :  { %v148_v9 = vmul.f32 %v147_v3, %v686_v56  ;;  %v173_v11 = vmul.f32 2.1237322e-06, %v699_v5  ;;  %v184_v12 = vmul.f32 3.8918573e-05, %v699_v5  ;;  %v137_v18 = vmul.f32 %v136_v4, %v686_v56 }
 0x19d   :  { %399 = vmatpush.msrb.mxu1 %v219_v7 }
 0x19e   :  { %v149_v15 = vadd.f32 0.112945676, %v148_v9  ;;  %v174_v19 = vadd.f32 0.00028619796, %v173_v11  ;;  %v185_v20 = vadd.f32 0.001143296, %v184_v12 }
 0x19f   :  { %v138_v33 = vadd.f32 0.05243302, %v137_v18 }
 0x1a0   :  { %v150_v23 = vmul.f32 %v149_v15, %v686_v56  ;;  %v175_v26 = vmul.f32 %v174_v19, %v699_v5  ;;  %v186_v27 = vmul.f32 %v185_v20, %v699_v5 }
 0x1a1   :  { %v139_v39 = vmul.f32 %v138_v33, %v686_v56 }
 0x1a2   :  { %v151_v31 = vadd.f32 0.4994258, %v150_v23  ;;  %v187_v34 = vadd.f32 0.014752088, %v186_v27  ;;  %v176_v36 = vadd.f32 0.0036580483, %v175_v26 }
 0x1a3   :  { %v140_v48 = vadd.f32 0.18741608, %v139_v39  ;;  %v247_v39 = vld [vmem:[%s961_s5 + $0x100] sm:$0xff] }
 0x1a4   :  { %v152_v35 = vmul.f32 %v151_v31, %v686_v56  ;;  %v188_v37 = vmul.f32 %v187_v34, %v699_v5  ;;  %v177_v41 = vmul.f32 %v176_v36, %v699_v5  ;;  %v258_v36 = vld [vmem:[%s961_s5 + $0x158] sm:$0xff] }
 0x1a5   :  { %v141_v2 = vmul.f32 %v140_v48, %v686_v56  ;;  %v222_v56 = vld [vmem:[%s961_s5 + $0x38] sm:$0xff]  ;;  %v225_v48 = vld [vmem:[%s961_s5 + $0x50] sm:$0xff] }
 0x1a6   :  { %v758_v38 = vadd.f32 1.0, %v152_v35  ;;  %v189_v40 = vadd.f32 0.112945676, %v188_v37  ;;  %v178_v51 = vadd.f32 0.05243302, %v177_v41  ;;  %468 = vmatpush.msra.mxu0 %v222_v56  ;;  %v257_v35 = vld [vmem:[%s961_s5 + $0x150] sm:$0xff] }
 0x1a7   :  { %v142_v11 = vadd.f32 1.1283791, %v141_v2  ;;  %v256_v37 = vld [vmem:[%s961_s5 + $0x148] sm:$0xff] }
 0x1a8   :  { %607 = vrcp.f32 %v758_v38  ;;  %v190_v45 = vmul.f32 %v189_v40, %v699_v5  ;;  %v179_v8 = vmul.f32 %v178_v51, %v699_v5  ;;  %v165_v10 = vand.u32 2147483648, %v758_v38  ;;  %v245_v40 = vld [vmem:[%s961_s5 + $0xf0] sm:$0xff] }
 0x1a9   :  { %v163_v13 = vand.u32 2147483647, %v758_v38  ;;  %vm159_vm9 = vweird.f32 %v758_v38  ;;  %v143_v18 = vmul.f32 %v142_v11, %v682_v54  ;;  %v263_v51 = vperm.slane %v259_v50, 0 }
 0x1aa   :  { %v191_v49 = vadd.f32 0.4994258, %v190_v45  ;;  %v180_v14 = vadd.f32 0.18741608, %v179_v8  ;;  %v166_v16 = vor.u32 1.1754944e-38, %v165_v10  ;;  %v128_v45 = vmul.f32 0.5, %v690_v60 }
 0x1ab   :  { %vm164_vm11 = vcmp.eq.f32.partialorder %v163_v13, 8.507059e+37  ;;  %v223_v60 = vld [vmem:[%s961_s5 + $0x40] sm:$0xff]  ;;  %v270_v10 = vperm.slane %v259_v50, 7 }
 0x1ac   :  { %v192_v58 = vmul.f32 %v191_v49, %v699_v5  ;;  %v181_v21 = vmul.f32 %v180_v14, %v699_v5 }
 0x1ae   :  { %v608_v0 = vpop.eup %607  ;;  %v193_v4 = vadd.f32 1.0, %v192_v58  ;;  %v182_v27 = vadd.f32 1.1283791, %v181_v21 }
 0x1af   :  { %v155_v3 = vmul.f32 %v608_v0, %v758_v38  ;;  %vm160_vm8 = vweird.f32 %v608_v0  ;;  %v246_v38 = vld [vmem:[%s961_s5 + $0xf8] sm:$0xff] }
 0x1b0   :  { %609 = vrcp.f32 %v193_v4  ;;  %vm161_vm10 = vmor %vm159_vm9, %vm160_vm8  ;;  %v205_v26 = vand.u32 2147483648, %v193_v4  ;;  %v203_v29 = vand.u32 2147483647, %v193_v4  ;;  %vm199_vm13 = vweird.f32 %v193_v4 }
 0x1b1   :  { %v156_v9 = vsub.f32 1.0, %v155_v3  ;;  %v183_v5 = vmul.f32 %v182_v27, %v693_v63 }
 0x1b2   :  { %v206_v33 = vor.u32 1.1754944e-38, %v205_v26  ;;  %vm204_vm1 = vcmp.eq.f32.partialorder %v203_v29, 8.507059e+37 }
 0x1b3   :  { %v157_v12 = vmul.f32 %v608_v0, %v156_v9  ;;  %v267_v9 = vperm.slane %v259_v50, 4 }
 0x1b5   :  { %v158_v15 = vadd.f32 %v608_v0, %v157_v12 }
 0x1b6   :  { %v610_v17 = vpop.eup %609 }
 0x1b7   :  { %v162_v19 = vsel %vm161_vm10, %v608_v0, %v158_v15  ;;  %v195_v22 = vmul.f32 %v610_v17, %v193_v4  ;;  %vm200_vm12 = vweird.f32 %v610_v17 }
 0x1b8   :  { %v167_v20 = vsel %vm164_vm11, %v166_v16, %v162_v19  ;;  %vm201_vm15 = vmor %vm199_vm13, %vm200_vm12  ;;  %v269_v19 = vperm.slane %v259_v50, 6 }
 0x1b9   :  { %v168_v23 = vmul.f32 %v167_v20, %v143_v18  ;;  %v196_v24 = vsub.f32 1.0, %v195_v22  ;;  %v268_v18 = vperm.slane %v259_v50, 5 }
 0x1bb   :  { %v573_v25 = vclamps-f32 %v168_v23, 1.0  ;;  %v197_v28 = vmul.f32 %v610_v17, %v196_v24 }
 0x1bd   :  { %v211_v31 = vadd.f32 1.0, %v573_v25  ;;  %v198_v32 = vadd.f32 %v610_v17, %v197_v28  ;;  %v260_v28 = vld [vmem:[%s962_s6 + $0x8] sm:$0x7] }
 0x1be   :  { %v271_v29 = vperm.slane %v260_v28, 0 }
 0x1bf   :  { %v213_v54 = vmul.f32 %v211_v31, %v127_v30  ;;  %v202_v34 = vsel %vm201_vm15, %v610_v17, %v198_v32 }
 0x1c0   :  { %v207_v53 = vsel %vm204_vm1, %v206_v33, %v202_v34  ;;  %v272_v34 = vperm.slane %v260_v28, 1 }
 0x1c1   :  { %575 = vmatmul.msk.f32.vlgmr.msra.gmra.mxu1 %vm285_vm14, %v213_v54  ;;  %577 = vmatmul.msk.f32.vlgmr.msra.gmra.mxu2 %vm285_vm14, %v213_v54  ;;  %v208_v63 = vmul.f32 %v207_v53, %v183_v5 }
 0x1c2   :  { %579 = vmatmul.msk.f32.vlgmr.msra.gmra.mxu3 %vm285_vm14, %v213_v54  ;;  %581 = vmatmul.msk.f32.vlgmr.msrb.gmra.mxu0 %vm285_vm14, %v213_v54 }
 0x1c3   :  { %511 = vmatpush.msra.mxu2 %v257_v35  ;;  %534 = vmatpush.msra.mxu3 %v258_v36  ;;  %v574_v41 = vclamps-f32 %v208_v63, 1.0  ;;  %v273_v35 = vperm.slane %v260_v28, 2 }
 0x1c4   :  { %488 = vmatpush.msra.mxu1 %v256_v37 }
 0x1c5   :  { %512 = vmatpush.msra.mxu2 %v246_v38  ;;  %535 = vmatpush.msra.mxu3 %v247_v39  ;;  %v212_v46 = vadd.f32 1.0, %v574_v41 }
 0x1c6   :  { %489 = vmatpush.msra.mxu1 %v245_v40 }
 0x1c7   :  { %513 = vmatpush.msra.mxu2 %v235_v42  ;;  %536 = vmatpush.msra.mxu3 %v236_v43  ;;  %v214_v49 = vmul.f32 %v212_v46, %v128_v45 }
 0x1c8   :  { %490 = vmatpush.msra.mxu1 %v234_v44 }
 0x1c9   :  { %514 = vmatpush.msra.mxu2 %v224_v47  ;;  %537 = vmatpush.msra.mxu3 %v225_v48 }
 0x1ca   :  { %576 = vmatmul.msk.f32.gmra.mxu1 %vm285_vm14, %v214_v49  ;;  %578 = vmatmul.msk.f32.gmra.mxu2 %vm285_vm14, %v214_v49 }
 0x1cb   :  { %580 = vmatmul.msk.f32.gmra.mxu3 %vm285_vm14, %v214_v49  ;;  %582 = vmatmul.msk.f32.gmra.mxu0 %vm285_vm14, %v214_v49 }
 0x1cc   :  { %491 = vmatpush.msra.mxu1 %v223_v60 }
 0x1d2   :  { %583 = vmatmul.msk.f32.vlgmr.msrb.gmra.mxu1 %vm285_vm14, %v213_v54  ;;  %585 = vmatmul.msk.f32.vlgmr.msrb.gmra.mxu2 %vm285_vm14, %v213_v54 }
 0x1d3   :  { %587 = vmatmul.msk.f32.vlgmr.msrb.gmra.mxu3 %vm285_vm14, %v213_v54  ;;  %589 = vmatmul.msk.f32.vlgmr.msra.gmra.mxu0 %vm285_vm14, %v213_v54 }
 0x1da   :  { %584 = vmatmul.msk.f32.gmra.mxu1 %vm285_vm14, %v214_v49  ;;  %586 = vmatmul.msk.f32.gmra.mxu2 %vm285_vm14, %v214_v49 }
 0x1db   :  { %588 = vmatmul.msk.f32.gmra.mxu3 %vm285_vm14, %v214_v49  ;;  %590 = vmatmul.msk.f32.gmra.mxu0 %vm285_vm14, %v214_v49 }
 0x1e2   :  { %591 = vmatmul.msk.f32.vlgmr.msra.gmra.mxu1 %vm285_vm14, %v213_v54  ;;  %593 = vmatmul.msk.f32.vlgmr.msra.gmra.mxu2 %vm285_vm14, %v213_v54 }
 0x1e3   :  { %595 = vmatmul.msk.f32.vlgmr.msra.gmra.mxu3 %vm285_vm14, %v213_v54 }
 0x1ea   :  { %592 = vmatmul.msk.f32.gmra.mxu1 %vm285_vm14, %v214_v49  ;;  %594 = vmatmul.msk.f32.gmra.mxu2 %vm285_vm14, %v214_v49 }
 0x1eb   :  { %596 = vmatmul.msk.f32.gmra.mxu3 %vm285_vm14, %v214_v49 }
 0x23e   :  { %v309_v55 = vpop.f32.mrf.mxu1 }
 0x23f   :  { %v310_v57 = vadd.f32 %v309_v55, %v263_v51  ;;  %v378_v58 = vpop.f32.mrf.mxu0 }
 0x240   :  { %v379_v59 = vadd.f32 %v378_v58, %v266_v52 }
 0x241   :  { %545 = vst [vmem:[%s963_s7] sm:$0xff] %v310_v57 }
 0x242   :  { %548 = vst [vmem:[%s963_s7 + $0x18] sm:$0xff] %v379_v59 }
 0x244   :  { %v332_v0 = vpop.f32.mrf.mxu2 }
 0x245   :  { %v333_v1 = vadd.f32 %v332_v0, %v264_v61  ;;  %v355_v2 = vpop.f32.mrf.mxu3 }
 0x246   :  { %v356_v3 = vadd.f32 %v355_v2, %v265_v62 }
 0x247   :  { %546 = vst [vmem:[%s963_s7 + $0x8] sm:$0xff] %v333_v1  ;;  %v312_v4 = vpop.f32.mrf.mxu1 }
 0x248   :  { %547 = vst [vmem:[%s963_s7 + $0x10] sm:$0xff] %v356_v3  ;;  %v313_v6 = vadd.f32 %v312_v4, %v263_v51  ;;  %v381_v7 = vpop.f32.mrf.mxu0 }
 0x249   :  { %v382_v8 = vadd.f32 %v381_v7, %v266_v52 }
 0x24a   :  { %556 = vst [vmem:[%s963_s7 + $0x58] sm:$0xff] %v313_v6 }
 0x24b   :  { %559 = vst [vmem:[%s963_s7 + $0x70] sm:$0xff] %v382_v8 }
 0x24d   :  { %v335_v56 = vpop.f32.mrf.mxu2 }
 0x24e   :  { %v336_v11 = vadd.f32 %v335_v56, %v264_v61  ;;  %v358_v12 = vpop.f32.mrf.mxu3 }
 0x24f   :  { %v359_v13 = vadd.f32 %v358_v12, %v265_v62  ;;  %v401_v14 = vpop.f32.mrf.mxu1 }
 0x250   :  { %557 = vst [vmem:[%s963_s7 + $0x60] sm:$0xff] %v336_v11  ;;  %v402_v15 = vadd.f32 %v401_v14, %v267_v9  ;;  %v470_v16 = vpop.f32.mrf.mxu0 }
 0x251   :  { %558 = vst [vmem:[%s963_s7 + $0x68] sm:$0xff] %v359_v13  ;;  %v471_v17 = vadd.f32 %v470_v16, %v270_v10 }
 0x252   :  { %549 = vst [vmem:[%s963_s7 + $0x20] sm:$0xff] %v402_v15 }
 0x253   :  { %552 = vst [vmem:[%s963_s7 + $0x38] sm:$0xff] %v471_v17 }
 0x255   :  { %v424_v20 = vpop.f32.mrf.mxu2 }
 0x256   :  { %v425_v21 = vadd.f32 %v424_v20, %v268_v18  ;;  %v447_v22 = vpop.f32.mrf.mxu3 }
 0x257   :  { %v448_v23 = vadd.f32 %v447_v22, %v269_v19  ;;  %v404_v24 = vpop.f32.mrf.mxu1 }
 0x258   :  { %550 = vst [vmem:[%s963_s7 + $0x28] sm:$0xff] %v425_v21  ;;  %v405_v25 = vadd.f32 %v404_v24, %v267_v9  ;;  %v473_v26 = vpop.f32.mrf.mxu0 }
 0x259   :  { %551 = vst [vmem:[%s963_s7 + $0x30] sm:$0xff] %v448_v23  ;;  %v474_v27 = vadd.f32 %v473_v26, %v270_v10 }
 0x25a   :  { %560 = vst [vmem:[%s963_s7 + $0x78] sm:$0xff] %v405_v25 }
 0x25b   :  { %563 = vst [vmem:[%s963_s7 + $0x90] sm:$0xff] %v474_v27 }
 0x25d   :  { %v427_v30 = vpop.f32.mrf.mxu2 }
 0x25e   :  { %v428_v31 = vadd.f32 %v427_v30, %v268_v18  ;;  %v450_v32 = vpop.f32.mrf.mxu3 }
 0x25f   :  { %v451_v54 = vadd.f32 %v450_v32, %v269_v19  ;;  %v493_v33 = vpop.f32.mrf.mxu1 }
 0x260   :  { %561 = vst [vmem:[%s963_s7 + $0x80] sm:$0xff] %v428_v31  ;;  %v494_v5 = vadd.f32 %v493_v33, %v271_v29 }
 0x261   :  { %562 = vst [vmem:[%s963_s7 + $0x88] sm:$0xff] %v451_v54 }
 0x262   :  { %553 = vst [vmem:[%s963_s7 + $0x40] sm:$0xff] %v494_v5 }
 0x265   :  { %v516_v36 = vpop.f32.mrf.mxu2 }
 0x266   :  { %v517_v53 = vadd.f32 %v516_v36, %v272_v34  ;;  %v539_v37 = vpop.f32.mrf.mxu3 }
 0x267   :  { %v540_v63 = vadd.f32 %v539_v37, %v273_v35  ;;  %v496_v38 = vpop.f32.mrf.mxu1 }
 0x268   :  { %554 = vst [vmem:[%s963_s7 + $0x48] sm:$0xff] %v517_v53  ;;  %v497_v39 = vadd.f32 %v496_v38, %v271_v29 }
 0x269   :  { %555 = vst.msk [vmem:[%s963_s7 + $0x50] sm:$0xff] %vm28_vm0, %v540_v63 }
 0x26a   :  { %564 = vst [vmem:[%s963_s7 + $0x98] sm:$0xff] %v497_v39 }
 0x26d   :  { %v519_v40 = vpop.f32.mrf.mxu2 }
 0x26e   :  { %v520_v41 = vadd.f32 %v519_v40, %v272_v34  ;;  %v542_v42 = vpop.f32.mrf.mxu3 }
 0x26f   :  { %v543_v43 = vadd.f32 %v542_v42, %v273_v35 }
 0x270   :  { %565 = vst [vmem:[%s963_s7 + $0xa0] sm:$0xff] %v520_v41 }
 0x271   :  { %566 = vst.msk [vmem:[%s963_s7 + $0xa8] sm:$0xff] %vm28_vm0, %v543_v43 }

</bundles_post_ra>
